<compile_context>
chip_gen: v6e
topology: v6e:2x2x1
jax: 0.10.0
libtpu: 0.0.40
codegen_flags: <defaults>
</compile_context>

<pallas_src>
import functools

import jax
import jax.numpy as jnp
import numpy as np
from jax.experimental import pallas as pl
from jax.experimental.pallas import tpu as pltpu


# ---------------------------------------------------------------------------
# Fused kernel: one tile of TR output rows = 3 accumulated MXU dots (K = 3C)
# plus the bias, with f32 accumulation in a VMEM scratch.
# ---------------------------------------------------------------------------
def _make_kernel(TR, Wo, C):
    TM, K = TR * Wo, 3 * C

    def kernel(ev_ref, evh_ref, od_ref, w_ref, b_ref, o_ref, acc_ref):
        e = ev_ref[0].reshape(TM, K)        # even rows r    -> kh=0 taps
        d = od_ref[0].reshape(TM, K)        # odd  rows r    -> kh=1 taps
        # Bias-initialized accumulator + the two row-aligned dots.
        acc_ref[...] = (b_ref[...]
                        + jnp.dot(e, w_ref[0], preferred_element_type=jnp.float32)
                        + jnp.dot(d, w_ref[1], preferred_element_type=jnp.float32))
        # kh=2 taps are even rows r+1: rows [Wo, TM) of this tile's even block
        # plus the 1-row halo block (even row (m+1)*TR) for the last output row.
        if TR > 1:
            acc_ref[:TM - Wo, :] += jnp.dot(
                e[Wo:], w_ref[2], preferred_element_type=jnp.float32)
        acc_ref[TM - Wo:, :] += jnp.dot(
            evh_ref[0, 0], w_ref[2], preferred_element_type=jnp.float32)
        o_ref[0] = acc_ref[...].reshape(TR, Wo, C).astype(o_ref.dtype)

    return kernel


def _pick_tr(Ho, Wo, C, itemsize, budget_bytes):
    """Largest divisor of Ho whose per-tile working set fits the VMEM budget."""
    # taps (2 slabs, double-buffered) + f32 out/acc + in-kernel temporaries
    per_row = Wo * C * (24 * itemsize + 20) + 1
    max_rows = max(1, int(budget_bytes // per_row))
    max_rows = min(max_rows, max(1, 8192 // max(Wo, 1)))   # keep TM <= ~8K rows
    tr = 1
    for d in range(1, Ho + 1):
        if Ho % d == 0 and d <= max_rows:
            tr = d
    return tr


# ---------------------------------------------------------------------------
# DownSample forward:  y = Conv2d(C, C, kernel_size=3, stride=2, padding=1)(x)
# ---------------------------------------------------------------------------
@functools.partial(jax.jit, static_argnames=("compute_dtype",))
def downsample(x_nchw, weight, bias, compute_dtype=jnp.bfloat16):
    """x_nchw: (N, C, H, W); weight: (C, C, 3, 3) PyTorch OIHW; bias: (C,)."""
    N, C, H, W = x_nchw.shape
    k, stride, pad = 3, 2, 1
    Ho = (H + 2 * pad - k) // stride + 1
    Wo = (W + 2 * pad - k) // stride + 1
    K = 3 * C
    cd = jnp.dtype(x_nchw.dtype) if compute_dtype is None else jnp.dtype(compute_dtype)
    out_dtype = x_nchw.dtype

    # --- generation-aware VMEM budget and M-tile size ----------------------
    try:
        vmem_cap = int(pltpu.get_tpu_info().vmem_capacity_bytes)
    except Exception:
        vmem_cap = 64 * 1024 * 1024                 # conservative (v7x) fallback
    vmem_limit = max(32 * 1024 * 1024,
                     min(int(vmem_cap * 0.65), 96 * 1024 * 1024))
    TR = _pick_tr(Ho, Wo, C, cd.itemsize, budget_bytes=vmem_limit // 2)
    Mt = Ho // TR
    TM = TR * Wo

    # --- glue (single cheap XLA pass): NCHW->NHWC, pad, row/col phase split.
    x = jnp.transpose(x_nchw, (0, 2, 3, 1)).astype(cd)           # NHWC
    Hp, Wp = 2 * Ho + 2, 2 * Wo + 2                              # >= H+2, W+2
    xp = jnp.pad(x, ((0, 0), (pad, Hp - H - pad), (pad, Wp - W - pad), (0, 0)))
    xe = xp[:, 0:2 * Ho + 1:2]     # even padded rows: (N, Ho+1, Wp, C)
    xo = xp[:, 1:2 * Ho:2]         # odd  padded rows: (N, Ho,   Wp, C)
    # kw taps concatenated on the channel dim -> K = 3C (kw-major, cin-minor).
    ev = jnp.concatenate([xe[:, :, kw:kw + 2 * Wo:2, :] for kw in range(3)],
                         axis=-1)                                # (N, Ho+1, Wo, 3C)
    od = jnp.concatenate([xo[:, :, kw:kw + 2 * Wo:2, :] for kw in range(3)],
                         axis=-1)                                # (N, Ho,   Wo, 3C)

    # PyTorch OIHW -> (kh, kw*Cin, Cout); bias kept f32 for the accumulator init.
    w_taps = jnp.transpose(weight, (2, 3, 1, 0)).reshape(3, K, C).astype(cd)
    bias2d = bias.reshape(1, C).astype(jnp.float32)

    ev_spec = pl.BlockSpec((1, TR, Wo, K), lambda n, m: (n, m, 0, 0))
    evh_spec = pl.BlockSpec((1, 1, Wo, K), lambda n, m: (n, (m + 1) * TR, 0, 0))
    od_spec = pl.BlockSpec((1, TR, Wo, K), lambda n, m: (n, m, 0, 0))
    w_spec = pl.BlockSpec((3, K, C), lambda n, m: (0, 0, 0))
    b_spec = pl.BlockSpec((1, C), lambda n, m: (0, 0))
    out_spec = pl.BlockSpec((1, TR, Wo, C), lambda n, m: (n, m, 0, 0))

    itemsize = cd.itemsize
    in_bytes = (N * ((Ho + 1) * Wo + Mt * Wo + Ho * Wo) * K * itemsize
                + 3 * K * C * itemsize + C * 4)
    out_bytes = N * Ho * Wo * C * jnp.dtype(out_dtype).itemsize

    out = pl.pallas_call(
        _make_kernel(TR, Wo, C),
        out_shape=jax.ShapeDtypeStruct((N, Ho, Wo, C), out_dtype),
        grid=(N, Mt),
        in_specs=[ev_spec, evh_spec, od_spec, w_spec, b_spec],
        out_specs=out_spec,
        scratch_shapes=[pltpu.VMEM((TM, C), jnp.float32)],
        compiler_params=pltpu.CompilerParams(
            dimension_semantics=("parallel", "parallel"),
            vmem_limit_bytes=vmem_limit,
        ),
        cost_estimate=pl.CostEstimate(
            flops=2 * N * Ho * Wo * 3 * K * C,
            transcendentals=0,
            bytes_accessed=in_bytes + out_bytes,
        ),
    )(ev, ev, od, w_taps, bias2d)

    return jnp.transpose(out, (0, 3, 1, 2))          # back to NCHW


# ---------------------------------------------------------------------------
# Demo / correctness check
# ---------------------------------------------------------------------------
if __name__ == "__main__":
    key = jax.random.PRNGKey(0)
    k_x, k_w, k_b = jax.random.split(key, 3)

    N, C, H, W = 2, 4, 16, 16
    x = jax.random.normal(k_x, (N, C, H, W), dtype=jnp.float32)

    # Deterministic parameter init (mimics PyTorch Conv2d default uniform range).
    fan_in = C * 3 * 3
    bound = 1.0 / np.sqrt(fan_in)
    weight = jax.random.uniform(k_w, (C, C, 3, 3), jnp.float32, -bound, bound)
    bias = jax.random.uniform(k_b, (C,), jnp.float32, -bound, bound)

    # Reference: XLA conv with identical semantics (NCHW, OIHW, stride 2, pad 1).
    y_ref = jax.lax.conv_general_dilated(
        x, weight, window_strides=(2, 2), padding=((1, 1), (1, 1)),
        dimension_numbers=("NCHW", "OIHW", "NCHW"),
    ) + bias.reshape(1, C, 1, 1)

    # f32 compute path: tight check of kernel logic against the conv reference.
    y32 = jax.block_until_ready(downsample(x, weight, bias, compute_dtype=None))
    assert y32.shape == (N, C, H // 2, W // 2), y32.shape
    np.testing.assert_allclose(np.asarray(y32), np.asarray(y_ref),
                               rtol=1e-5, atol=1e-5)

    # Default bf16-operand path (MXU-native): looser tolerance, f32 accumulation.
    y16 = jax.block_until_ready(downsample(x, weight, bias))
    assert y16.shape == (N, C, H // 2, W // 2), y16.shape
    np.testing.assert_allclose(np.asarray(y16), np.asarray(y_ref),
                               rtol=5e-2, atol=5e-2)

    print("KERNEL_OK")
</pallas_src>

<mosaic_0001>
module attributes {stable_mosaic.version = 11 : i64} {
  func.func @kernel(%arg0: i32, %arg1: i32, %arg2: memref<1x8x8x12xf32, #tpu.memory_space<vmem>>, %arg3: memref<1x1x8x12xf32, #tpu.memory_space<vmem>>, %arg4: memref<1x8x8x12xf32, #tpu.memory_space<vmem>>, %arg5: memref<3x12x4xf32, #tpu.memory_space<vmem>>, %arg6: memref<1x4xf32, #tpu.memory_space<vmem>>, %arg7: memref<1x8x8x4xf32, #tpu.memory_space<vmem>>, %arg8: memref<64x4xf32, #tpu.memory_space<vmem>>) attributes {dimension_semantics = [#tpu.dimension_semantics<parallel>, #tpu.dimension_semantics<parallel>], iteration_bounds = array<i64: 2, 1>, scalar_prefetch = 0 : i64, scratch_operands = 1 : i64, tpu.core_type = #tpu.core_type<tc>, window_params = [{transform_indices = @transform_0, window_bounds = array<i64: 1, 8, 8, 12>}, {transform_indices = @transform_1, window_bounds = array<i64: 1, 1, 8, 12>}, {transform_indices = @transform_2, window_bounds = array<i64: 1, 8, 8, 12>}, {pipeline_mode = #tpu.pipeline_mode<synchronous>, transform_indices = @transform_3, window_bounds = array<i64: 3, 12, 4>}, {pipeline_mode = #tpu.pipeline_mode<synchronous>, transform_indices = @transform_4, window_bounds = array<i64: 1, 4>}, {transform_indices = @transform_5, window_bounds = array<i64: 1, 8, 8, 4>}]} {
    %c0 = arith.constant 0 : index
    %c0_0 = arith.constant 0 : index
    %c0_1 = arith.constant 0 : index
    %c0_2 = arith.constant 0 : index
    %0 = vector.load %arg2[%c0, %c0_0, %c0_1, %c0_2] : memref<1x8x8x12xf32, #tpu.memory_space<vmem>>, vector<1x8x8x12xf32>
    %1 = vector.shape_cast %0 : vector<1x8x8x12xf32> to vector<8x8x12xf32>
    %2 = vector.shape_cast %1 : vector<8x8x12xf32> to vector<64x12xf32>
    %c0_3 = arith.constant 0 : index
    %c0_4 = arith.constant 0 : index
    %c0_5 = arith.constant 0 : index
    %c0_6 = arith.constant 0 : index
    %3 = vector.load %arg4[%c0_3, %c0_4, %c0_5, %c0_6] : memref<1x8x8x12xf32, #tpu.memory_space<vmem>>, vector<1x8x8x12xf32>
    %4 = vector.shape_cast %3 : vector<1x8x8x12xf32> to vector<8x8x12xf32>
    %5 = vector.shape_cast %4 : vector<8x8x12xf32> to vector<64x12xf32>
    %c0_7 = arith.constant 0 : index
    %c0_8 = arith.constant 0 : index
    %6 = vector.load %arg6[%c0_7, %c0_8] : memref<1x4xf32, #tpu.memory_space<vmem>>, vector<1x4xf32>
    %c0_9 = arith.constant 0 : index
    %c0_10 = arith.constant 0 : index
    %c0_11 = arith.constant 0 : index
    %7 = vector.load %arg5[%c0_9, %c0_10, %c0_11] : memref<3x12x4xf32, #tpu.memory_space<vmem>>, vector<1x12x4xf32>
    %8 = vector.shape_cast %7 : vector<1x12x4xf32> to vector<12x4xf32>
    %cst = arith.constant dense<0.000000e+00> : vector<64x4xf32>
    %9 = tpu.matmul %2, %8, %cst {dimension_numbers = #tpu.dot_dimension_numbers<[1], [0], [0], [1], [0, 0, 1, 1], [], []>} : vector<64x12xf32>, vector<12x4xf32>, vector<64x4xf32> -> vector<64x4xf32>
    %10 = vector.broadcast %6 : vector<1x4xf32> to vector<64x4xf32>
    %11 = arith.addf %10, %9 : vector<64x4xf32>
    %c1 = arith.constant 1 : index
    %c0_12 = arith.constant 0 : index
    %c0_13 = arith.constant 0 : index
    %12 = vector.load %arg5[%c1, %c0_12, %c0_13] : memref<3x12x4xf32, #tpu.memory_space<vmem>>, vector<1x12x4xf32>
    %13 = vector.shape_cast %12 : vector<1x12x4xf32> to vector<12x4xf32>
    %cst_14 = arith.constant dense<0.000000e+00> : vector<64x4xf32>
    %14 = tpu.matmul %5, %13, %cst_14 {dimension_numbers = #tpu.dot_dimension_numbers<[1], [0], [0], [1], [0, 0, 1, 1], [], []>} : vector<64x12xf32>, vector<12x4xf32>, vector<64x4xf32> -> vector<64x4xf32>
    %15 = arith.addf %11, %14 : vector<64x4xf32>
    %c0_15 = arith.constant 0 : index
    %c0_16 = arith.constant 0 : index
    %16 = vector.load %arg8[%c0_15, %c0_16] : memref<64x4xf32, #tpu.memory_space<vmem>>, vector<64x4xf32>
    tpu.vector_store %arg8[%c0_15, %c0_16], %15 {strides = array<i32>} : memref<64x4xf32, #tpu.memory_space<vmem>>, vector<64x4xf32>,
    %c0_17 = arith.constant 0 : index
    %c0_18 = arith.constant 0 : index
    %17 = vector.load %arg8[%c0_17, %c0_18] : memref<64x4xf32, #tpu.memory_space<vmem>>, vector<56x4xf32>
    %18 = vector.extract_strided_slice %2 {offsets = [8, 0], sizes = [56, 12], strides = [1, 1]} : vector<64x12xf32> to vector<56x12xf32>
    %c2 = arith.constant 2 : index
    %c0_19 = arith.constant 0 : index
    %c0_20 = arith.constant 0 : index
    %19 = vector.load %arg5[%c2, %c0_19, %c0_20] : memref<3x12x4xf32, #tpu.memory_space<vmem>>, vector<1x12x4xf32>
    %20 = vector.shape_cast %19 : vector<1x12x4xf32> to vector<12x4xf32>
    %cst_21 = arith.constant dense<0.000000e+00> : vector<56x4xf32>
    %21 = tpu.matmul %18, %20, %cst_21 {dimension_numbers = #tpu.dot_dimension_numbers<[1], [0], [0], [1], [0, 0, 1, 1], [], []>} : vector<56x12xf32>, vector<12x4xf32>, vector<56x4xf32> -> vector<56x4xf32>
    %22 = arith.addf %17, %21 : vector<56x4xf32>
    %c0_22 = arith.constant 0 : index
    %c0_23 = arith.constant 0 : index
    %23 = vector.load %arg8[%c0_22, %c0_23] : memref<64x4xf32, #tpu.memory_space<vmem>>, vector<56x4xf32>
    tpu.vector_store %arg8[%c0_22, %c0_23], %22 {strides = array<i32>} : memref<64x4xf32, #tpu.memory_space<vmem>>, vector<56x4xf32>,
    %c56 = arith.constant 56 : index
    %c0_24 = arith.constant 0 : index
    %24 = vector.load %arg8[%c56, %c0_24] : memref<64x4xf32, #tpu.memory_space<vmem>>, vector<8x4xf32>
    %c0_25 = arith.constant 0 : index
    %c0_26 = arith.constant 0 : index
    %c0_27 = arith.constant 0 : index
    %c0_28 = arith.constant 0 : index
    %25 = vector.load %arg3[%c0_25, %c0_26, %c0_27, %c0_28] : memref<1x1x8x12xf32, #tpu.memory_space<vmem>>, vector<1x1x8x12xf32>
    %26 = vector.shape_cast %25 : vector<1x1x8x12xf32> to vector<8x12xf32>
    %c2_29 = arith.constant 2 : index
    %c0_30 = arith.constant 0 : index
    %c0_31 = arith.constant 0 : index
    %27 = vector.load %arg5[%c2_29, %c0_30, %c0_31] : memref<3x12x4xf32, #tpu.memory_space<vmem>>, vector<1x12x4xf32>
    %28 = vector.shape_cast %27 : vector<1x12x4xf32> to vector<12x4xf32>
    %cst_32 = arith.constant dense<0.000000e+00> : vector<8x4xf32>
    %29 = tpu.matmul %26, %28, %cst_32 {dimension_numbers = #tpu.dot_dimension_numbers<[1], [0], [0], [1], [0, 0, 1, 1], [], []>} : vector<8x12xf32>, vector<12x4xf32>, vector<8x4xf32> -> vector<8x4xf32>
    %30 = arith.addf %24, %29 : vector<8x4xf32>
    %c56_33 = arith.constant 56 : index
    %c0_34 = arith.constant 0 : index
    %31 = vector.load %arg8[%c56_33, %c0_34] : memref<64x4xf32, #tpu.memory_space<vmem>>, vector<8x4xf32>
    tpu.vector_store %arg8[%c56_33, %c0_34], %30 {strides = array<i32>} : memref<64x4xf32, #tpu.memory_space<vmem>>, vector<8x4xf32>,
    %c0_35 = arith.constant 0 : index
    %c0_36 = arith.constant 0 : index
    %32 = vector.load %arg8[%c0_35, %c0_36] : memref<64x4xf32, #tpu.memory_space<vmem>>, vector<64x4xf32>
    %33 = vector.shape_cast %32 : vector<64x4xf32> to vector<8x8x4xf32>
    %c0_37 = arith.constant 0 : index
    %c0_38 = arith.constant 0 : index
    %c0_39 = arith.constant 0 : index
    %c0_40 = arith.constant 0 : index
    %34 = vector.load %arg7[%c0_37, %c0_38, %c0_39, %c0_40] : memref<1x8x8x4xf32, #tpu.memory_space<vmem>>, vector<1x8x8x4xf32>
    %35 = vector.shape_cast %34 : vector<1x8x8x4xf32> to vector<8x8x4xf32>
    %36 = vector.shape_cast %33 : vector<8x8x4xf32> to vector<1x8x8x4xf32>
    tpu.vector_store %arg7[%c0_37, %c0_38, %c0_39, %c0_40], %36 {strides = array<i32>} : memref<1x8x8x4xf32, #tpu.memory_space<vmem>>, vector<1x8x8x4xf32>,
    return
  }
  func.func @transform_0(%arg0: i32, %arg1: i32) -> (i32, i32, i32, i32) {
    %c0_i32 = arith.constant 0 : i32
    %c0_i32_0 = arith.constant 0 : i32
    %c0_i32_1 = arith.constant 0 : i32
    return %arg0, %arg1, %c0_i32, %c0_i32_0 : i32, i32, i32, i32
  }
  func.func @transform_1(%arg0: i32, %arg1: i32) -> (i32, i32, i32, i32) {
    %c1_i32 = arith.constant 1 : i32
    %0 = arith.addi %arg1, %c1_i32 : i32
    %c8_i32 = arith.constant 8 : i32
    %1 = arith.muli %0, %c8_i32 : i32
    %c0_i32 = arith.constant 0 : i32
    %c0_i32_0 = arith.constant 0 : i32
    %c0_i32_1 = arith.constant 0 : i32
    return %arg0, %1, %c0_i32, %c0_i32_0 : i32, i32, i32, i32
  }
  func.func @transform_2(%arg0: i32, %arg1: i32) -> (i32, i32, i32, i32) {
    %c0_i32 = arith.constant 0 : i32
    %c0_i32_0 = arith.constant 0 : i32
    %c0_i32_1 = arith.constant 0 : i32
    return %arg0, %arg1, %c0_i32, %c0_i32_0 : i32, i32, i32, i32
  }
  func.func @transform_3(%arg0: i32, %arg1: i32) -> (i32, i32, i32) {
    %c0_i32 = arith.constant 0 : i32
    %c0_i32_0 = arith.constant 0 : i32
    %c0_i32_1 = arith.constant 0 : i32
    %c0_i32_2 = arith.constant 0 : i32
    return %c0_i32, %c0_i32_0, %c0_i32_1 : i32, i32, i32
  }
  func.func @transform_4(%arg0: i32, %arg1: i32) -> (i32, i32) {
    %c0_i32 = arith.constant 0 : i32
    %c0_i32_0 = arith.constant 0 : i32
    %c0_i32_1 = arith.constant 0 : i32
    return %c0_i32, %c0_i32_0 : i32, i32
  }
  func.func @transform_5(%arg0: i32, %arg1: i32) -> (i32, i32, i32, i32) {
    %c0_i32 = arith.constant 0 : i32
    %c0_i32_0 = arith.constant 0 : i32
    %c0_i32_1 = arith.constant 0 : i32
    return %arg0, %arg1, %c0_i32, %c0_i32_0 : i32, i32, i32, i32
  }
}

</mosaic_0001>

<bundles_post_ra>
// kernel: downsample.1
= control target key start
LH: loop header
LB: loop body
LE: loop exit
PB: predicated region body
PF: predicated region fallthrough
CT: control target
= control target key end

     0   :  { %s1269_s18 = smov 0   ;;  %s1271_s19 = smov 0   ;;  %s1440_s0 = inlined_call_operand.vmem [shape: f32[2,9,8,12], index: 0, kind: input, shape index: {}, may-alias: {0,1}]   ;;  %s1441_s1 = inlined_call_operand.vmem [shape: f32[2,9,8,12], index: 1, kind: input, shape index: {}, may-alias: {0,1}]   ;;  %s1442_s2 = inlined_call_operand.vmem [shape: f32[2,8,8,12], index: 2, kind: input, shape index: {}]   ;;  %s1443_s3 = inlined_call_operand.vmem [shape: f32[3,12,4], index: 3, kind: input, shape index: {}]   ;;  %s1444_s4 = inlined_call_operand.vmem [shape: f32[1,4], index: 4, kind: input, shape index: {}]   ;;  %s1445_s5 = inlined_call_operand.vmem [shape: f32[2,8,8,4], index: 5, kind: output, shape index: {}]  }
   0x1   :  { %s1273_s20 = smov 0  }
   0x2 LB: > { %s27_s21 = sadd.s32 1, %s1231_s19  ;;  %p1036_p0 = scmp.ge.s32.totalorder %s1235_s20, 1  ;;  %s1235_s20 = sphi %s1273_s20, %s15_s20   ;;  %s1231_s19 = sphi %s1271_s19, %s1447_s19   ;;  %s1227_s18 = sphi %s1269_s18, %s1446_s18  }
   0x3   : > { %p29_p1 = scmp.ge.s32.totalorder %s27_s21, 2  ;;  %p256_p2 = scmp.lt.s32.totalorder %s1235_s20, 3 }
   0x5   : > { %s1449_s21 = smov (%p29_p1, %s27_s21), 0  ;;  %p257_p3 = pnand %p1036_p0, %p256_p2 }
   0x6   : > { %p320_p4 = scmp.lt.s32.totalorder (!%p257_p3), %s1227_s18, 1 }
   0x7   : > { %260 = sbr.rel (%p257_p3) target bundleno = 259 (0x103), region = 40 }
   0xc   : > { %v383_v0 = vld [vmem:[%s1443_s3 + $0x8] sm:$0xf]  ;;  %vm409_vm0 = vcmask 1043456   ;;  %v382_v1 = vld [vmem:[%s1443_s3] sm:$0xff]  ;;  %s1451_s18 = smov (!%p320_p4, %s1227_s18), 1  ;;  %vm384_vm1 = vcmask 97280  }
   0xd   : > { %1180 = vmatprep.subr.msk.mxu1 %vm409_vm0, %v383_v0  ;;  %1116 = vmatprep.subr.msk.mxu0 %vm409_vm0, %v383_v0  ;;  %v1054_v2 = vld [vmem:[%s1443_s3 + $0x18] sm:$0xf]  ;;  %s1184_s28 = smul.u32 72, %s1451_s18  ;;  %v1237_v3 = vmov 0.0   ;;  %v1053_v8 = vld [vmem:[%s1443_s3 + $0x10] sm:$0xff]  ;;  %s1082_s11 = sshll.u32 %s1451_s18, 6 }
   0xe   : > { %1182 = vmatpush3.msk.msra.mxu1 %vm409_vm0, %v383_v0  ;;  %1117 = vmatpush3.msk.msra.mxu0 %vm409_vm0, %v383_v0  ;;  %v1065_v10 = vld [vmem:[%s1443_s3 + $0x28] sm:$0xf]  ;;  %v1064_v13 = vld [vmem:[%s1443_s3 + $0x20] sm:$0xff]  ;;  %s1332_s16 = scalar_lea.vmem %s1442_s2, %s1082_s11  ;;  %vm1238_vm2 = vmmov 0   ;;  %vm675_vm3 = vcmask 31744  }
   0xf   : > { %1181 = vmatprep.subr.mxu1 %v382_v1  ;;  %1118 = vmatprep.subr.mxu0 %v382_v1  ;;  %s327_s6 = scalar_lea.vmem %s1440_s0, %s1184_s28  ;;  %v373_v15 = vld [vmem:[%s1332_s16] sm:$0xff]  ;;  %v374_v16 = vld [vmem:[%s1332_s16 + $0x8] sm:$0xff]  ;;  %v375_v17 = vld [vmem:[%s1332_s16 + $0x10] sm:$0xff]  ;;  %s1081_s23 = sadd.s32 64, %s1184_s28 }
  0x10   : > { %1183 = vmatpush3.msra.mxu1 %v382_v1  ;;  %1119 = vmatpush3.msra.mxu0 %v382_v1  ;;  %v367_v4 = vld [vmem:[%s327_s6 + $0x10] sm:$0xff]  ;;  %v368_v5 = vld [vmem:[%s327_s6 + $0x18] sm:$0xff]  ;;  %v369_v6 = vld [vmem:[%s327_s6 + $0x20] sm:$0xff]  ;;  %s342_s26 = scalar_lea.vmem %s1441_s1, %s1081_s23 }
  0x11   : > { %1132 = vmatprep.subr.msk.mxu1 %vm409_vm0, %v1054_v2  ;;  %1148 = vmatprep.subr.mxu0 %v1237_v3  ;;  %v365_v7 = vld [vmem:[%s327_s6] sm:$0xff]  ;;  %v366_v9 = vld [vmem:[%s327_s6 + $0x8] sm:$0xff]  ;;  %v371_v12 = vld [vmem:[%s327_s6 + $0x30] sm:$0xff] }
  0x12   : > { %1123 = vmatprep.mubr.msk.f32.mxu1 %vm384_vm1, %v367_v4  ;;  %1120 = vmatprep.mubr.msk.f32.mxu0 %vm384_vm1, %v365_v7  ;;  %v370_v11 = vld [vmem:[%s327_s6 + $0x28] sm:$0xff]  ;;  %v372_v14 = vld [vmem:[%s327_s6 + $0x38] sm:$0xff]  ;;  %v377_v20 = vld [vmem:[%s1332_s16 + $0x20] sm:$0xff]  ;;  %s1408_s6 = scalar_lea.vmem %s1445_s5, %s1082_s11 }
  0x13   : > { %1124 = vmatmul.mubr.msk.f32.vlgmr.msra.gmra.mxu1 %vm384_vm1, %v368_v5  ;;  %1121 = vmatmul.mubr.msk.f32.vlgmr.msra.gmra.mxu0 %vm384_vm1, %v366_v9  ;;  %v1075_v18 = vld [vmem:[%s1443_s3 + $0x28] sm:$0xf]  ;;  %v376_v19 = vld [vmem:[%s1332_s16 + $0x18] sm:$0xff]  ;;  %v379_v22 = vld [vmem:[%s1332_s16 + $0x30] sm:$0xff] }
  0x14   : > { %1133 = vmatpush3.msk.msra.mxu1 %vm409_vm0, %v1054_v2  ;;  %1126 = vmatprep.mubr.msk.f32.mxu1 %vm384_vm1, %v369_v6  ;;  %v378_v21 = vld [vmem:[%s1332_s16 + $0x28] sm:$0xff]  ;;  %v380_v23 = vld [vmem:[%s1332_s16 + $0x38] sm:$0xff]  ;;  %v812_v24 = vld [vmem:[%s342_s26] sm:$0xff] }
  0x15   : > { %1134 = vmatprep.subr.mxu1 %v1053_v8  ;;  %1149 = vmatpush3.msk.msra.mxu0 %vm409_vm0, %v1065_v10  ;;  %v1052_v34 = vld [vmem:[%s1444_s4] ss:$0 sm:$0xff] }
  0x16   : > { %1135 = vmatpush3.msra.mxu1 %v1053_v8  ;;  %1150 = vmatprep.subr.mxu0 %v1237_v3 }
  0x17   : > { %1127 = vmatmul.mubr.msk.f32.gmra.mxu1 %vm384_vm1, %v370_v11  ;;  %1151 = vmatpush3.msra.mxu0 %v1064_v13 }
  0x18   : > { %1129 = vmatprep.mubr.msk.f32.mxu1 %vm384_vm1, %v371_v12  ;;  %1152 = vmatprep.mubr.msk.f32.mxu0 %vm1238_vm2, %v1237_v3 }
  0x19   : > { %1173 = vmatprep.subr.mxu1 %v1237_v3  ;;  %1153 = vmatmul.mubr.msk.f32.vlgmr.msra.gmra.mxu0 %vm384_vm1, %v366_v9 }
  0x1a   : > { %1155 = vmatprep.mubr.msk.f32.mxu0 %vm1238_vm2, %v1237_v3 }
  0x1b   : > { %1130 = vmatmul.mubr.msk.f32.gmra.mxu1 %vm384_vm1, %v372_v14 }
  0x1c   : > { %1136 = vmatprep.mubr.msk.f32.mxu1 %vm384_vm1, %v373_v15 }
  0x1d   : > { %1156 = vmatmul.mubr.msk.f32.gmra.mxu0 %vm384_vm1, %v367_v4 }
  0x1e   : > { %1158 = vmatprep.mubr.msk.f32.mxu0 %vm1238_vm2, %v1237_v3 }
  0x1f   : > { %1137 = vmatmul.mubr.msk.f32.vlgmr.msra.gmra.mxu1 %vm384_vm1, %v374_v16 }
  0x20   : > { %1139 = vmatprep.mubr.msk.f32.mxu1 %vm384_vm1, %v375_v17  ;;  %1174 = vmatpush3.msk.msra.mxu1 %vm409_vm0, %v1075_v18 }
  0x21   : > { %1175 = vmatprep.subr.mxu1 %v1237_v3  ;;  %1159 = vmatmul.mubr.msk.f32.gmra.mxu0 %vm384_vm1, %v368_v5 }
  0x22   : > { %1176 = vmatpush3.msra.mxu1 %v1064_v13  ;;  %1161 = vmatprep.mubr.msk.f32.mxu0 %vm1238_vm2, %v1237_v3 }
  0x23   : > { %1140 = vmatmul.mubr.msk.f32.gmra.mxu1 %vm384_vm1, %v376_v19 }
  0x24   : > { %1142 = vmatprep.mubr.msk.f32.mxu1 %vm384_vm1, %v377_v20 }
  0x25   : > { %1162 = vmatmul.mubr.msk.f32.gmra.mxu0 %vm384_vm1, %v369_v6 }
  0x26   : > { %1164 = vmatprep.mubr.msk.f32.mxu0 %vm1238_vm2, %v1237_v3 }
  0x27   : > { %1143 = vmatmul.mubr.msk.f32.gmra.mxu1 %vm384_vm1, %v378_v21 }
  0x28   : > { %1145 = vmatprep.mubr.msk.f32.mxu1 %vm384_vm1, %v379_v22 }
  0x29   : > { %1165 = vmatmul.mubr.msk.f32.gmra.mxu0 %vm384_vm1, %v370_v11 }
  0x2a   : > { %1167 = vmatprep.mubr.msk.f32.mxu0 %vm1238_vm2, %v1237_v3 }
  0x2b   : > { %1146 = vmatmul.mubr.msk.f32.gmra.mxu1 %vm384_vm1, %v380_v23 }
  0x2c   : > { %1177 = vmatprep.mubr.msk.f32.mxu1 %vm1238_vm2, %v1237_v3 }
  0x2d   : > { %1168 = vmatmul.mubr.msk.f32.gmra.mxu0 %vm384_vm1, %v371_v12 }
  0x2e   : > { %1170 = vmatprep.mubr.msk.f32.mxu0 %vm1238_vm2, %v1237_v3 }
  0x2f   : > { %1178 = vmatmul.mubr.msk.f32.vlgmr.msra.gmra.mxu1 %vm384_vm1, %v812_v24 }
  0x31   : > { %1171 = vmatmul.mubr.msk.f32.gmra.mxu0 %vm384_vm1, %v372_v14 }
  0xd3   : > { %v1125_v25 = vpop.f32.mrf.mxu1  ;;  %v1122_v27 = vpop.f32.mrf.mxu0 }
  0xd4   : > { %v525_v36 = vadd.f32 %v1122_v27, %v1052_v34  ;;  %v527_v43 = vadd.f32 %v1125_v25, %v1052_v34 }
  0xd5   : > { %v489_v26 = vpop.f32.mrf.mxu1  ;;  %v479_v29 = vpop.f32.mrf.mxu0 }
  0xd6   : > { %v524_v39 = vadd.f32 %v1052_v34, %v479_v29  ;;  %v526_v47 = vadd.f32 %v1052_v34, %v489_v26 }
  0xd7   : > { %v1128_v28 = vpop.f32.mrf.mxu1 }
  0xd8   : > { %v529_v51 = vadd.f32 %v1128_v28, %v1052_v34 }
  0xd9   : > { %v499_v30 = vpop.f32.mrf.mxu1  ;;  %v763_v31 = vpop.f32.mrf.mxu0 }
  0xda   : > { %v528_v55 = vadd.f32 %v1052_v34, %v499_v30 }
  0xdb   : > { %v1131_v32 = vpop.f32.mrf.mxu1  ;;  %v1154_v33 = vpop.f32.mrf.mxu0 }
  0xdc   : > { %v531_v60 = vadd.f32 %v1131_v32, %v1052_v34 }
  0xdd   : > { %v509_v35 = vpop.f32.mrf.mxu1  ;;  %v768_v37 = vpop.f32.mrf.mxu0 }
  0xde   : > { %v530_v2 = vadd.f32 %v1052_v34, %v509_v35 }
  0xdf   : > { %v1138_v38 = vpop.f32.mrf.mxu1  ;;  %v1157_v41 = vpop.f32.mrf.mxu0 }
  0xe0   : > { %v668_v40 = vadd.f32 %v1138_v38, %v525_v36 }
  0xe1   : > { %v628_v42 = vpop.f32.mrf.mxu1  ;;  %v773_v45 = vpop.f32.mrf.mxu0 }
  0xe2   : > { %677 = vst.msk [vmem:[#allocation2 + $0x8] sm:$0xff] %vm675_vm3, %v668_v40  ;;  %v667_v44 = vadd.f32 %v628_v42, %v524_v39 }
  0xe3   : > { %v1141_v46 = vpop.f32.mrf.mxu1  ;;  %v1160_v49 = vpop.f32.mrf.mxu0 }
  0xe4   : > { %676 = vst.msk [vmem:[#allocation2] sm:$0xff] %vm675_vm3, %v667_v44  ;;  %v670_v48 = vadd.f32 %v1141_v46, %v527_v43 }
  0xe5   : > { %v638_v50 = vpop.f32.mrf.mxu1  ;;  %v778_v53 = vpop.f32.mrf.mxu0 }
  0xe6   : > { %679 = vst.msk [vmem:[#allocation2 + $0x18] sm:$0xff] %vm675_vm3, %v670_v48  ;;  %v669_v52 = vadd.f32 %v638_v50, %v526_v47 }
  0xe7   : > { %v1144_v54 = vpop.f32.mrf.mxu1  ;;  %v1163_v57 = vpop.f32.mrf.mxu0 }
  0xe8   : > { %678 = vst.msk [vmem:[#allocation2 + $0x10] sm:$0xff] %vm675_vm3, %v669_v52  ;;  %v672_v56 = vadd.f32 %v1144_v54, %v529_v51 }
  0xe9   : > { %v685_v58 = vld [vmem:[#allocation2 + $0x8] sm:$0xff]  ;;  %v648_v59 = vpop.f32.mrf.mxu1  ;;  %v783_v63 = vpop.f32.mrf.mxu0 }
  0xea   : > { %v798_v61 = vadd.f32 %v768_v37, %v685_v58  ;;  %681 = vst.msk [vmem:[#allocation2 + $0x28] sm:$0xff] %vm675_vm3, %v672_v56  ;;  %v671_v62 = vadd.f32 %v648_v59, %v528_v55 }
  0xeb   : > { %v684_v0 = vld [vmem:[#allocation2] sm:$0xff]  ;;  %v1147_v1 = vpop.f32.mrf.mxu1  ;;  %v1166_v5 = vpop.f32.mrf.mxu0 }
  0xec   : > { %v797_v3 = vadd.f32 %v763_v31, %v684_v0  ;;  %805 = vst.msk [vmem:[#allocation2 + $0x8] sm:$0xff] %vm675_vm3, %v798_v61  ;;  %680 = vst.msk [vmem:[#allocation2 + $0x20] sm:$0xff] %vm675_vm3, %v671_v62  ;;  %v674_v4 = vadd.f32 %v1147_v1, %v531_v60 }
  0xed   : > { %v687_v6 = vld [vmem:[#allocation2 + $0x18] sm:$0xff]  ;;  %v658_v7 = vpop.f32.mrf.mxu1  ;;  %v788_v10 = vpop.f32.mrf.mxu0 }
  0xee   : > { %804 = vst.msk [vmem:[#allocation2] sm:$0xff] %vm675_vm3, %v797_v3  ;;  %v800_v8 = vadd.f32 %v778_v53, %v687_v6  ;;  %683 = vst.msk [vmem:[#allocation2 + $0x38] sm:$0xff] %vm675_vm3, %v674_v4  ;;  %v673_v9 = vadd.f32 %v658_v7, %v530_v2 }
  0xef   : > { %v686_v11 = vld [vmem:[#allocation2 + $0x10] sm:$0xff]  ;;  %v887_v12 = vpop.f32.mrf.mxu1  ;;  %v1169_v14 = vpop.f32.mrf.mxu0 }
  0xf0   : > { %v799_v13 = vadd.f32 %v773_v45, %v686_v11  ;;  %807 = vst.msk [vmem:[#allocation2 + $0x18] sm:$0xff] %vm675_vm3, %v800_v8  ;;  %682 = vst.msk [vmem:[#allocation2 + $0x30] sm:$0xff] %vm675_vm3, %v673_v9 }
  0xf1   : > { %v689_v15 = vld [vmem:[#allocation2 + $0x28] sm:$0xff]  ;;  %v1179_v16 = vpop.f32.mrf.mxu1  ;;  %v793_v18 = vpop.f32.mrf.mxu0 }
  0xf2   : > { %806 = vst.msk [vmem:[#allocation2 + $0x10] sm:$0xff] %vm675_vm3, %v799_v13  ;;  %v802_v17 = vadd.f32 %v788_v10, %v689_v15 }
  0xf3   : > { %v894_v19 = vld [vmem:[#allocation2 + $0x8] sm:$0xff]  ;;  %v688_v20 = vld [vmem:[#allocation2 + $0x20] sm:$0xff]  ;;  %v1172_v22 = vpop.f32.mrf.mxu0 }
  0xf4   : > { %902 = vst.msk [vmem:[%s1408_s6 + $0x8] sm:$0xff] %vm675_vm3, %v894_v19  ;;  %v801_v21 = vadd.f32 %v783_v63, %v688_v20  ;;  %809 = vst.msk [vmem:[#allocation2 + $0x28] sm:$0xff] %vm675_vm3, %v802_v17 }
  0xf5   : > { %v893_v23 = vld [vmem:[#allocation2] sm:$0xff]  ;;  %v811_v24 = vld [vmem:[#allocation2 + $0x38] sm:$0xff] }
  0xf6   : > { %901 = vst.msk [vmem:[%s1408_s6] sm:$0xff] %vm675_vm3, %v893_v23  ;;  %808 = vst.msk [vmem:[#allocation2 + $0x20] sm:$0xff] %vm675_vm3, %v801_v21  ;;  %v891_v25 = vadd.f32 %v887_v12, %v811_v24 }
  0xf7   : > { %v896_v26 = vld [vmem:[#allocation2 + $0x18] sm:$0xff]  ;;  %v690_v27 = vld [vmem:[#allocation2 + $0x30] sm:$0xff] }
  0xf8   : > { %904 = vst.msk [vmem:[%s1408_s6 + $0x18] sm:$0xff] %vm675_vm3, %v896_v26  ;;  %v803_v28 = vadd.f32 %v793_v18, %v690_v27  ;;  %892 = vst.msk [vmem:[#allocation2 + $0x38] sm:$0xff] %vm675_vm3, %v891_v25 }
  0xf9   : > { %v895_v29 = vld [vmem:[#allocation2 + $0x10] sm:$0xff] }
  0xfa   : > { %903 = vst.msk [vmem:[%s1408_s6 + $0x10] sm:$0xff] %vm675_vm3, %v895_v29  ;;  %810 = vst.msk [vmem:[#allocation2 + $0x30] sm:$0xff] %vm675_vm3, %v803_v28 }
  0xfb   : > { %v898_v30 = vld [vmem:[#allocation2 + $0x28] sm:$0xff] }
  0xfc   : > { %906 = vst.msk [vmem:[%s1408_s6 + $0x28] sm:$0xff] %vm675_vm3, %v898_v30 }
  0xfd   : > { %v897_v31 = vld [vmem:[#allocation2 + $0x20] sm:$0xff] }
  0xfe   : > { %905 = vst.msk [vmem:[%s1408_s6 + $0x20] sm:$0xff] %vm675_vm3, %v897_v31 }
  0xff   : > { %v900_v32 = vld [vmem:[#allocation2 + $0x38] sm:$0xff] }
 0x100   : > { %908 = vst.msk [vmem:[%s1408_s6 + $0x38] sm:$0xff] %vm675_vm3, %v900_v32 }
 0x101   : > { %v899_v33 = vld [vmem:[#allocation2 + $0x30] sm:$0xff] }
 0x102   : > { %907 = vst.msk [vmem:[%s1408_s6 + $0x30] sm:$0xff] %vm675_vm3, %v899_v33 }
 0x103 PF: > { %s15_s20 = sadd.s32 1, %s1235_s20   ;;  %s1446_s18 = smov %s1231_s19 }
 0x104   : > { %p12_p5 = scmp.ge.s32.totalorder %s15_s20, 4   ;;  %s1447_s19 = smov %s1449_s21 }
 0x106   :  { %14 = sbr.rel (!%p12_p5) target bundleno = 2 (0x2), region = 78 }

</bundles_post_ra>
